<compile_context>
chip_gen: v7x
topology: tpu7x:2x2x1
jax: 0.10.0
libtpu: 0.0.40
codegen_flags: <defaults>
</compile_context>

<pallas_src>
import functools

import jax
import jax.numpy as jnp
from jax import lax
from jax.experimental import pallas as pl
from jax.experimental.pallas import tpu as pltpu


# ----------------------------------------------------------------------------
# Generation-aware knobs
# ----------------------------------------------------------------------------
def _vmem_limit_bytes():
    # ~75% of physical VMEM, capped at 64 MiB: 64 MiB on v5e/v6e (128 MiB parts),
    # 48 MiB on v7x (64 MiB part) so Mosaic keeps headroom for its internal scratch.
    try:
        cap = int(pltpu.get_tpu_info().vmem_capacity_bytes)
    except Exception:  # unknown chip / interpret mode
        cap = 128 * 1024 * 1024
    return min(64 * 1024 * 1024, (cap * 3) // 4)


_VMEM_LIMIT = _vmem_limit_bytes()
# Larger tiles on 128-MiB parts amortize the ~0.35us per-grid-step overhead; 256 on v7x.
_DEF_TT = 512 if _VMEM_LIMIT >= 64 * 1024 * 1024 else 256   # time tile (conv backbones)
_DEF_TM = _DEF_TT                                           # row tile (linears)

try:  # pipeline_mode=pl.Buffered(1): single-buffer constant-index weight operands
    pl.BlockSpec((8, 128), lambda i: (i, 0), pipeline_mode=pl.Buffered(1))
    _HAS_BUFFERED1 = True
except Exception:
    _HAS_BUFFERED1 = False


def _round_up(x, m):
    return ((x + m - 1) // m) * m


def _cparams(*sems):
    return pltpu.CompilerParams(dimension_semantics=sems, vmem_limit_bytes=_VMEM_LIMIT)


def _wspec(shape, index_map):
    # BlockSpec for weights/biases/codebooks with a constant index map: one VMEM buffer.
    if _HAS_BUFFERED1:
        return pl.BlockSpec(shape, index_map, pipeline_mode=pl.Buffered(1))
    return pl.BlockSpec(shape, index_map)


def _bf16(a):
    return a.astype(jnp.bfloat16)


# ----------------------------------------------------------------------------
# In-kernel math helpers
# ----------------------------------------------------------------------------
def _erf(x):
    # Abramowitz & Stegun 7.1.26 polynomial erf approximation (|err| < 1.5e-7).
    # torch nn.GELU() is the exact (erf-based) GELU.
    a1, a2, a3, a4, a5 = 0.254829592, -0.284496736, 1.421413741, -1.453152027, 1.061405429
    p = 0.3275911
    ax = jnp.abs(x)
    t = 1.0 / (1.0 + p * ax)
    poly = ((((a5 * t + a4) * t + a3) * t + a2) * t + a1) * t
    y = 1.0 - poly * jnp.exp(-ax * ax)
    return jnp.where(x >= 0.0, y, -y)


def _gelu(x):
    return 0.5 * x * (1.0 + _erf(x * 0.7071067811865476))


def _window(xm, xc, xp, t, nt):
    # (8 + TT + 8, C) halo window [left 8 rows ; current tile ; right 8 rows].
    # Out-of-range halos are zeroed so tap slices reproduce Conv1d zero padding.
    left = jnp.where(t > 0, xm, 0.0)
    right = jnp.where(t < nt - 1, xp, 0.0)
    return jnp.concatenate([left, xc, right], axis=0)


def _store_tile(o_ref, y, t, T, TT):
    # Keep the invariant "rows with global index >= T are exactly zero" so the next
    # conv's zero-padding semantics stay correct when T was rounded up to a tile
    # multiple.  Only the last time tile pays the mask (pl.when-guarded).
    if T % TT == 0:
        o_ref[0] = y
    else:
        nt = pl.num_programs(1)

        @pl.when(t < nt - 1)
        def _():
            o_ref[0] = y

        @pl.when(t == nt - 1)
        def _():
            row = lax.broadcasted_iota(jnp.int32, (TT, 1), 0) + t * TT
            o_ref[0] = jnp.where(row < T, y, 0.0)


# ----------------------------------------------------------------------------
# Pallas kernels
# ----------------------------------------------------------------------------
def _linear_kernel(x_ref, w_ref, b_ref, o_ref):
    # y = x @ w + b ; bf16 operands, f32 accumulation.
    o_ref[...] = (
        jnp.dot(x_ref[...].astype(jnp.bfloat16), w_ref[...],
                preferred_element_type=jnp.float32) + b_ref[...]
    ).astype(o_ref.dtype)


def _ln_linear_kernel(x_ref, g_ref, beta_ref, w_ref, b_ref, o_ref):
    # Fused LayerNorm(eps=1e-6, f32) + Linear (bf16 MXU, f32 accumulation).
    x = x_ref[...]
    mu = jnp.mean(x, axis=-1, keepdims=True)
    var = jnp.mean(jnp.square(x - mu), axis=-1, keepdims=True)
    xn = (x - mu) * lax.rsqrt(var + 1e-6) * g_ref[...] + beta_ref[...]
    o_ref[...] = (
        jnp.dot(xn.astype(jnp.bfloat16), w_ref[...],
                preferred_element_type=jnp.float32) + b_ref[...]
    ).astype(o_ref.dtype)


def _embed_ln_kernel(xm_ref, xc_ref, xp_ref, w_ref, b_ref, g_ref, beta_ref, o_ref, *, T, TT):
    # VocosBackbone embed Conv1d(k=7, pad=3) fused with the following LayerNorm.
    # Halos are 8-row neighbour blocks; the 7 taps are static slices of a (TT+16, C)
    # window feeding bf16 MXU matmuls with an f32 accumulator.
    t = pl.program_id(1)
    nt = pl.num_programs(1)
    win = _window(xm_ref[0], xc_ref[0], xp_ref[0], t, nt).astype(jnp.bfloat16)  # (TT+16, Cin)
    D = w_ref.shape[2]
    acc = jnp.zeros((TT, D), jnp.float32)
    for k in range(7):  # static unrolled taps; output row i reads window row 8+i+(k-3)
        acc = acc + jnp.dot(win[5 + k: 5 + k + TT, :], w_ref[k],
                            preferred_element_type=jnp.float32)
    acc = acc + b_ref[...]
    mu = jnp.mean(acc, axis=-1, keepdims=True)
    var = jnp.mean(jnp.square(acc - mu), axis=-1, keepdims=True)
    y = (acc - mu) * lax.rsqrt(var + 1e-6) * g_ref[...] + beta_ref[...]
    _store_tile(o_ref, y, t, T, TT)


def _convnext_kernel(xm_ref, xc_ref, xp_ref, dww_ref, dwb_ref, lng_ref, lnb_ref,
                     w1_ref, b1_ref, w2_ref, b2_ref, gam_ref, o_ref, *, T, TT):
    # Fused ConvNeXt block: depthwise conv k=7 (f32 VPU) -> LayerNorm -> Linear (bf16 MXU)
    #                       -> GELU -> Linear (bf16 MXU) -> layer-scale gamma -> residual.
    t = pl.program_id(1)
    nt = pl.num_programs(1)
    xc = xc_ref[0]                                    # (TT, D) f32
    win = _window(xm_ref[0], xc, xp_ref[0], t, nt)    # (TT+16, D) f32
    y = dwb_ref[...] + xc * dww_ref[3]                # center tap straight from the tile
    for k in range(7):
        if k == 3:
            continue
        y = y + win[5 + k: 5 + k + TT, :] * dww_ref[k]
    mu = jnp.mean(y, axis=-1, keepdims=True)
    var = jnp.mean(jnp.square(y - mu), axis=-1, keepdims=True)
    yn = (y - mu) * lax.rsqrt(var + 1e-6) * lng_ref[...] + lnb_ref[...]
    h = _gelu(jnp.dot(yn.astype(jnp.bfloat16), w1_ref[...],
                      preferred_element_type=jnp.float32) + b1_ref[...])
    h2 = jnp.dot(h.astype(jnp.bfloat16), w2_ref[...],
                 preferred_element_type=jnp.float32) + b2_ref[...]
    _store_tile(o_ref, xc + gam_ref[...] * h2, t, T, TT)


def _fvq_kernel(e_ref, cb_ref, cbn_ref, wout_ref, bout_ref, q_ref, idx_ref, err_ref, *,
                k_chunk):
    # FactorizedVectorQuantize core (kept f32 for index parity with torch):
    # l2-normalized nearest-neighbour search, K-chunked with a running (max, idx, row)
    # carry, fused with the 1x1 out_project.  argmin(dist) == argmax(cross) after
    # normalization; lowest-index tie-break preserved (strict > across chunks).
    e = e_ref[...]                                   # (TM, d)
    TM, d = e.shape
    K = cb_ref.shape[0]
    en = e * lax.rsqrt(jnp.sum(e * e, axis=-1, keepdims=True) + 1e-12)

    best = jnp.full((TM, 1), -jnp.inf, jnp.float32)
    best_idx = jnp.zeros((TM, 1), jnp.int32)
    zq = jnp.zeros((TM, d), jnp.float32)
    for c in range(K // k_chunk):                    # static chunk loop
        cb_c = cb_ref[c * k_chunk:(c + 1) * k_chunk, :]    # raw codebook rows
        cbn_c = cbn_ref[c * k_chunk:(c + 1) * k_chunk, :]  # pre-normalized (wrapper)
        cross = lax.dot_general(en, cbn_c, dimension_numbers=(((1,), (1,)), ((), ())),
                                preferred_element_type=jnp.float32)    # (TM, KC)
        iota = lax.broadcasted_iota(jnp.int32, cross.shape, 1)
        mx = jnp.max(cross, axis=1, keepdims=True)
        loc = jnp.min(jnp.where(cross >= mx, iota, jnp.int32(k_chunk)),
                      axis=1, keepdims=True)                           # (TM, 1)
        onehot = (iota == loc).astype(jnp.float32)
        zq_c = jnp.dot(onehot, cb_c, preferred_element_type=jnp.float32)
        better = mx > best
        best = jnp.where(better, mx, best)
        best_idx = jnp.where(better, loc + c * k_chunk, best_idx)
        zq = jnp.where(better, zq_c, zq)

    q_ref[...] = (jnp.dot(zq, wout_ref[...], preferred_element_type=jnp.float32)
                  + bout_ref[...]).astype(q_ref.dtype)
    # lane-dense 1-D outputs (unmasked stores)
    idx_ref[...] = best_idx[:, 0]
    err_ref[...] = jnp.sum(jnp.square(e - zq), axis=-1)


# ----------------------------------------------------------------------------
# Kernel wrappers (tiling, padding, BlockSpecs)
# ----------------------------------------------------------------------------
def linear(x, w, b, *, tm=None):
    # x: (M, K), w: (K, N), b: (N,) -> (M, N); M-tiled, parallel grid, bf16 weight.
    M, K = x.shape
    N = w.shape[1]
    TM = min(tm or _DEF_TM, _round_up(M, 8))
    Mp = _round_up(M, TM)
    xp = x if Mp == M else jnp.pad(x, ((0, Mp - M), (0, 0)))
    out = pl.pallas_call(
        _linear_kernel,
        out_shape=jax.ShapeDtypeStruct((Mp, N), jnp.float32),
        grid=(Mp // TM,),
        in_specs=[
            pl.BlockSpec((TM, K), lambda i: (i, 0)),
            _wspec((K, N), lambda i: (0, 0)),
            _wspec((1, N), lambda i: (0, 0)),
        ],
        out_specs=pl.BlockSpec((TM, N), lambda i: (i, 0)),
        compiler_params=_cparams("parallel"),
    )(xp, _bf16(w), b.reshape(1, N))
    return out if Mp == M else out[:M]


def ln_linear(x, g, beta, w, b, *, tm=None):
    # LayerNorm(eps=1e-6) over the last dim of x, then x @ w + b.  M-tiled.
    M, D = x.shape
    N = w.shape[1]
    TM = min(tm or _DEF_TM, _round_up(M, 8))
    Mp = _round_up(M, TM)
    xp = x if Mp == M else jnp.pad(x, ((0, Mp - M), (0, 0)))
    out = pl.pallas_call(
        _ln_linear_kernel,
        out_shape=jax.ShapeDtypeStruct((Mp, N), jnp.float32),
        grid=(Mp // TM,),
        in_specs=[
            pl.BlockSpec((TM, D), lambda i: (i, 0)),
            _wspec((1, D), lambda i: (0, 0)),
            _wspec((1, D), lambda i: (0, 0)),
            _wspec((D, N), lambda i: (0, 0)),
            _wspec((1, N), lambda i: (0, 0)),
        ],
        out_specs=pl.BlockSpec((TM, N), lambda i: (i, 0)),
        compiler_params=_cparams("parallel"),
    )(xp, g.reshape(1, D), beta.reshape(1, D), _bf16(w), b.reshape(1, N))
    return out if Mp == M else out[:M]


def conv7_ln(x, w, b, g, beta, *, T, TT):
    # x: (B, Tp, Cin) with rows >= T zero; w: (7, Cin, D).  Grid (B, Tp//TT); halos are
    # 8-row neighbour blocks (clamped index maps), no full prev/next tile fetch.
    B, Tp, Cin = x.shape
    D = w.shape[2]
    nt = Tp // TT
    r = TT // 8
    nblk8 = Tp // 8
    kern = functools.partial(_embed_ln_kernel, T=T, TT=TT)
    c2 = lambda bi, ti: (0, 0)
    return pl.pallas_call(
        kern,
        out_shape=jax.ShapeDtypeStruct((B, Tp, D), jnp.float32),
        grid=(B, nt),
        in_specs=[
            pl.BlockSpec((1, 8, Cin), lambda bi, ti: (bi, jnp.maximum(ti * r - 1, 0), 0)),
            pl.BlockSpec((1, TT, Cin), lambda bi, ti: (bi, ti, 0)),
            pl.BlockSpec((1, 8, Cin),
                         lambda bi, ti: (bi, jnp.minimum((ti + 1) * r, nblk8 - 1), 0)),
            _wspec((7, Cin, D), lambda bi, ti: (0, 0, 0)),
            _wspec((1, D), c2),
            _wspec((1, D), c2),
            _wspec((1, D), c2),
        ],
        out_specs=pl.BlockSpec((1, TT, D), lambda bi, ti: (bi, ti, 0)),
        compiler_params=_cparams("parallel", "parallel"),
    )(x, x, x, _bf16(w), b.reshape(1, D), g.reshape(1, D), beta.reshape(1, D))


def convnext_block(x, blk, *, T, TT):
    # x: (B, Tp, D) -> (B, Tp, D); grid (B, Tp//TT), both axes parallel (megacore-friendly).
    B, Tp, D = x.shape
    I = blk["w1"].shape[1]
    nt = Tp // TT
    r = TT // 8
    nblk8 = Tp // 8
    kern = functools.partial(_convnext_kernel, T=T, TT=TT)
    c2 = lambda bi, ti: (0, 0)
    return pl.pallas_call(
        kern,
        out_shape=jax.ShapeDtypeStruct((B, Tp, D), jnp.float32),
        grid=(B, nt),
        in_specs=[
            pl.BlockSpec((1, 8, D), lambda bi, ti: (bi, jnp.maximum(ti * r - 1, 0), 0)),
            pl.BlockSpec((1, TT, D), lambda bi, ti: (bi, ti, 0)),
            pl.BlockSpec((1, 8, D),
                         lambda bi, ti: (bi, jnp.minimum((ti + 1) * r, nblk8 - 1), 0)),
            _wspec((7, D), c2),
            _wspec((1, D), c2),
            _wspec((1, D), c2),
            _wspec((1, D), c2),
            _wspec((D, I), c2),
            _wspec((1, I), c2),
            _wspec((I, D), c2),
            _wspec((1, D), c2),
            _wspec((1, D), c2),
        ],
        out_specs=pl.BlockSpec((1, TT, D), lambda bi, ti: (bi, ti, 0)),
        compiler_params=_cparams("parallel", "parallel"),
    )(x, x, x, blk["dw_w"], blk["dw_b"].reshape(1, D), blk["ln_g"].reshape(1, D),
      blk["ln_b"].reshape(1, D), _bf16(blk["w1"]), blk["b1"].reshape(1, I),
      _bf16(blk["w2"]), blk["b2"].reshape(1, D), blk["gamma"].reshape(1, D))


def fvq_quantize(z_e, codebook, w_out, b_out, *, tm=None):
    # z_e: (M, d) -> quantized-and-projected (M, H), indices (M,), per-row sq_err (M,).
    M, d = z_e.shape
    K = codebook.shape[0]
    H = w_out.shape[1]
    TM = min(tm or max(128, _DEF_TM // 2), _round_up(M, 8))
    Mp = _round_up(M, TM)
    z = z_e if Mp == M else jnp.pad(z_e, ((0, Mp - M), (0, 0)))
    # normalize the codebook once (not per M-tile inside the kernel)
    cbn = codebook * lax.rsqrt(jnp.sum(codebook * codebook, axis=-1, keepdims=True) + 1e-12)
    # chunk the codebook search so (TM, KC) intermediates stay small at production K
    kc = K
    if K > 1024:
        for cand in (1024, 512, 256, 128):
            if K % cand == 0:
                kc = cand
                break
    q, idx, err = pl.pallas_call(
        functools.partial(_fvq_kernel, k_chunk=kc),
        out_shape=(
            jax.ShapeDtypeStruct((Mp, H), jnp.float32),
            jax.ShapeDtypeStruct((Mp,), jnp.int32),
            jax.ShapeDtypeStruct((Mp,), jnp.float32),
        ),
        grid=(Mp // TM,),
        in_specs=[
            pl.BlockSpec((TM, d), lambda i: (i, 0)),
            _wspec((K, d), lambda i: (0, 0)),
            _wspec((K, d), lambda i: (0, 0)),
            _wspec((d, H), lambda i: (0, 0)),
            _wspec((1, H), lambda i: (0, 0)),
        ],
        out_specs=(
            pl.BlockSpec((TM, H), lambda i: (i, 0)),
            pl.BlockSpec((TM,), lambda i: (i,)),
            pl.BlockSpec((TM,), lambda i: (i,)),
        ),
        compiler_params=_cparams("parallel"),
    )(z, codebook, cbn, w_out, b_out.reshape(1, H))
    return q[:M], idx[:M], err[:M]


# ----------------------------------------------------------------------------
# Model composition (glue in plain JAX)
# ----------------------------------------------------------------------------
def vocos_backbone(x, p, *, tt=None):
    # x: (B, T, C_in) channels-last -> (B, T, dim).  The trailing LayerNorm of the torch
    # VocosBackbone is fused into the following ln_linear projection by the caller.
    B, T, _ = x.shape
    TT = min(tt or _DEF_TT, _round_up(T, 8))
    Tp = _round_up(T, TT)
    if Tp != T:
        x = jnp.pad(x, ((0, 0), (0, Tp - T), (0, 0)))   # one-time pad to a tile multiple
    x = conv7_ln(x, p["embed_w"], p["embed_b"], p["norm_g"], p["norm_b"], T=T, TT=TT)
    for blk in p["blocks"]:
        x = convnext_block(x, blk, T=T, TT=TT)
    return x[:, :T, :] if Tp != T else x


def coco_content_forward(params, whisper_feats):
    B, T, Dw = whisper_feats.shape
    H = params["w_in_w"].shape[1]
    cd = params["codebook"].shape[1]

    # whisper_input_layer
    x = linear(whisper_feats.reshape(B * T, Dw), params["w_in_w"], params["w_in_b"])
    x = x.reshape(B, T, H)

    # encoder = VocosBackbone (embed conv + LN fused, fused ConvNeXt blocks)
    xe = vocos_backbone(x, params["enc"])
    Vd = xe.shape[-1]

    # final LayerNorm + [encoder-output Linear ∘ VQ in_project] folded into one fused kernel
    # TODO(synk): weight_norm reparameterization of the WNConv1d projections is assumed
    # already folded into plain (w, b); apply the fold when importing a torch state_dict.
    w_enc_vq = jnp.dot(params["enc_out_w"], params["vq_in_w"])
    b_enc_vq = jnp.dot(params["enc_out_b"], params["vq_in_w"]) + params["vq_in_b"]
    z_e = ln_linear(xe.reshape(B * T, Vd), params["enc"]["final_g"], params["enc"]["final_b"],
                    w_enc_vq, b_enc_vq)                                   # (B*T, cd)

    # ResidualVQ (num_quantizers=1): FVQ lookup + 1x1 out_project fused in one kernel
    q_out, idx, sq_err = fvq_quantize(z_e, params["codebook"],
                                      params["vq_out_w"], params["vq_out_b"])
    q_out = q_out.reshape(B, T, H)

    # commit / codebook losses (FVQ mean over (codebook_dim, T) per batch element)
    mse_per_batch = sq_err.reshape(B, T).sum(axis=1) / (T * cd)
    commit_losses = mse_per_batch * 0.15          # commitment = 0.15
    codebook_losses = mse_per_batch * 1.0         # codebook_loss_weight = 1.0
    codebook_loss = jnp.mean(codebook_losses + commit_losses)
    all_indices = idx.reshape(B, T)[None, :, :]   # (num_quantizers=1, B, T)

    # decoder = VocosBackbone
    xd = vocos_backbone(q_out, params["dec"])
    Vd2 = xd.shape[-1]

    # The length fixup of the torch model is a no-op here (decoder preserves T), so the
    # decoder-output Linear and whisper_output_layer fold into one matmul.
    # TODO(synk): if a config ever changes T inside the decoder, re-materialize x_rec and
    # apply the slice / last-frame padding before the whisper_output_layer.
    w_dec_out = jnp.dot(params["dec_out_w"], params["w_out_w"])
    b_dec_out = jnp.dot(params["dec_out_b"], params["w_out_w"]) + params["w_out_b"]
    whisper_rec = ln_linear(xd.reshape(B * T, Vd2), params["dec"]["final_g"],
                            params["dec"]["final_b"], w_dec_out, b_dec_out)
    whisper_rec = whisper_rec.reshape(B, T, Dw)
    return whisper_rec, codebook_loss, all_indices


# ----------------------------------------------------------------------------
# Deterministic synthetic parameter init (mirrors module __init__ / reset_parameters)
# ----------------------------------------------------------------------------
def _tn(key, shape, std=0.02):
    # trunc_normal_(std=0.02, a=-2, b=2): truncation inactive at this std -> plain normal.
    return jax.random.normal(key, shape, jnp.float32) * std


def make_backbone_params(key, c_in, dim, inter, num_layers):
    keys = jax.random.split(key, 1 + 4 * num_layers)
    p = {
        "embed_w": _tn(keys[0], (7, c_in, dim)),
        "embed_b": jnp.zeros((dim,), jnp.float32),
        "norm_g": jnp.ones((dim,), jnp.float32),
        "norm_b": jnp.zeros((dim,), jnp.float32),
        "final_g": jnp.ones((dim,), jnp.float32),
        "final_b": jnp.zeros((dim,), jnp.float32),
        "blocks": [],
    }
    for l in range(num_layers):
        k0, k1, k2, _ = keys[1 + 4 * l: 1 + 4 * (l + 1)]
        p["blocks"].append({
            "dw_w": _tn(k0, (7, dim)),                  # depthwise Conv1d(dim, dim, 7, groups=dim)
            "dw_b": jnp.zeros((dim,), jnp.float32),
            "ln_g": jnp.ones((dim,), jnp.float32),
            "ln_b": jnp.zeros((dim,), jnp.float32),
            "w1": _tn(k1, (dim, inter)),
            "b1": jnp.zeros((inter,), jnp.float32),
            "w2": _tn(k2, (inter, dim)),
            "b2": jnp.zeros((dim,), jnp.float32),
            "gamma": jnp.full((dim,), 1.0 / num_layers, jnp.float32),   # layer-scale init
        })
    return p


def make_params(key, cfg):
    Dw, H = cfg["whisper_dim"], cfg["hidden_size"]
    Vd, Vi, Vl = cfg["vocos_dim"], cfg["vocos_intermediate_dim"], cfg["vocos_num_layers"]
    K, cd = cfg["codebook_size"], cfg["codebook_dim"]
    ks = jax.random.split(key, 10)
    return {
        "w_in_w": _tn(ks[0], (Dw, H)), "w_in_b": jnp.zeros((H,), jnp.float32),
        "enc": make_backbone_params(ks[1], H, Vd, Vi, Vl),
        "enc_out_w": _tn(ks[2], (Vd, H)), "enc_out_b": jnp.zeros((H,), jnp.float32),
        "vq_in_w": _tn(ks[3], (H, cd)), "vq_in_b": jnp.zeros((cd,), jnp.float32),
        "codebook": jax.random.normal(ks[4], (K, cd), jnp.float32),     # nn.Embedding N(0,1)
        "vq_out_w": _tn(ks[5], (cd, H)), "vq_out_b": jnp.zeros((H,), jnp.float32),
        "dec": make_backbone_params(ks[6], H, Vd, Vi, Vl),
        "dec_out_w": _tn(ks[7], (Vd, H)), "dec_out_b": jnp.zeros((H,), jnp.float32),
        "w_out_w": _tn(ks[8], (H, Dw)), "w_out_b": jnp.zeros((Dw,), jnp.float32),
    }


# ----------------------------------------------------------------------------
if __name__ == "__main__":
    cfg = dict(
        whisper_dim=32,        # real model uses 1024; small synthetic shapes here
        hidden_size=32,
        codebook_size=64,
        codebook_dim=8,
        vocos_dim=32,
        vocos_intermediate_dim=64,
        vocos_num_layers=2,
    )
    key = jax.random.PRNGKey(0)
    kp, kx = jax.random.split(key)
    params = make_params(kp, cfg)

    B, T = 2, 16
    whisper_feats = jax.random.normal(kx, (B, T, cfg["whisper_dim"]), jnp.float32)

    whisper_rec, codebook_loss, all_indices = coco_content_forward(params, whisper_feats)
    jax.block_until_ready((whisper_rec, codebook_loss, all_indices))

    assert whisper_rec.shape == (B, T, cfg["whisper_dim"])
    assert whisper_rec.dtype == jnp.float32
    assert all_indices.shape == (1, B, T)
    assert codebook_loss.shape == ()
    print("KERNEL_OK")
</pallas_src>

<mosaic_0001>
module attributes {stable_mosaic.version = 11 : i64} {
  func.func @_linear_kernel(%arg0: i32, %arg1: memref<32x32xf32, #tpu.memory_space<vmem>>, %arg2: memref<32x32xbf16, #tpu.memory_space<vmem>>, %arg3: memref<1x32xf32, #tpu.memory_space<vmem>>, %arg4: memref<32x32xf32, #tpu.memory_space<vmem>>) attributes {dimension_semantics = [#tpu.dimension_semantics<parallel>], iteration_bounds = array<i64: 1>, scalar_prefetch = 0 : i64, scratch_operands = 0 : i64, tpu.core_type = #tpu.core_type<tc>, window_params = [{transform_indices = @transform_0, window_bounds = array<i64: 32, 32>}, {pipeline_mode = #tpu.pipeline_mode<synchronous>, transform_indices = @transform_1, window_bounds = array<i64: 32, 32>}, {pipeline_mode = #tpu.pipeline_mode<synchronous>, transform_indices = @transform_2, window_bounds = array<i64: 1, 32>}, {transform_indices = @transform_3, window_bounds = array<i64: 32, 32>}]} {
    %c0 = arith.constant 0 : index
    %c0_0 = arith.constant 0 : index
    %0 = vector.load %arg1[%c0, %c0_0] : memref<32x32xf32, #tpu.memory_space<vmem>>, vector<32x32xf32>
    %1 = arith.truncf %0 : vector<32x32xf32> to vector<32x32xbf16>
    %c0_1 = arith.constant 0 : index
    %c0_2 = arith.constant 0 : index
    %2 = vector.load %arg2[%c0_1, %c0_2] : memref<32x32xbf16, #tpu.memory_space<vmem>>, vector<32x32xbf16>
    %cst = arith.constant dense<0.000000e+00> : vector<32x32xf32>
    %3 = tpu.matmul %1, %2, %cst {dimension_numbers = #tpu.dot_dimension_numbers<[1], [0], [0], [1], [0, 0, 1, 1], [], []>} : vector<32x32xbf16>, vector<32x32xbf16>, vector<32x32xf32> -> vector<32x32xf32>
    %c0_3 = arith.constant 0 : index
    %c0_4 = arith.constant 0 : index
    %4 = vector.load %arg3[%c0_3, %c0_4] : memref<1x32xf32, #tpu.memory_space<vmem>>, vector<1x32xf32>
    %5 = vector.broadcast %4 : vector<1x32xf32> to vector<32x32xf32>
    %6 = arith.addf %3, %5 : vector<32x32xf32>
    %c0_5 = arith.constant 0 : index
    %c0_6 = arith.constant 0 : index
    %7 = vector.load %arg4[%c0_5, %c0_6] : memref<32x32xf32, #tpu.memory_space<vmem>>, vector<32x32xf32>
    tpu.vector_store %arg4[%c0_5, %c0_6], %6 {strides = array<i32>} : memref<32x32xf32, #tpu.memory_space<vmem>>, vector<32x32xf32>,
    return
  }
  func.func @transform_0(%arg0: i32) -> (i32, i32) {
    %c0_i32 = arith.constant 0 : i32
    %c0_i32_0 = arith.constant 0 : i32
    return %arg0, %c0_i32 : i32, i32
  }
  func.func @transform_1(%arg0: i32) -> (i32, i32) {
    %c0_i32 = arith.constant 0 : i32
    %c0_i32_0 = arith.constant 0 : i32
    %c0_i32_1 = arith.constant 0 : i32
    return %c0_i32, %c0_i32_0 : i32, i32
  }
  func.func @transform_2(%arg0: i32) -> (i32, i32) {
    %c0_i32 = arith.constant 0 : i32
    %c0_i32_0 = arith.constant 0 : i32
    %c0_i32_1 = arith.constant 0 : i32
    return %c0_i32, %c0_i32_0 : i32, i32
  }
  func.func @transform_3(%arg0: i32) -> (i32, i32) {
    %c0_i32 = arith.constant 0 : i32
    %c0_i32_0 = arith.constant 0 : i32
    return %arg0, %c0_i32 : i32, i32
  }
}

</mosaic_0001>

<bundles_post_ra>
// kernel: tpu_custom_call.1
= control target key start
LH: loop header
LB: loop body
LE: loop exit
PB: predicated region body
PF: predicated region fallthrough
CT: control target
= control target key end

     0   :  { %8 = vsyncpa [#allocation3], 0  ;;  %s371_s0 = inlined_call_operand.hbm [shape: f32[32,32], index: 0, kind: input, shape index: {}]   ;;  %s372_s1 = inlined_call_operand.hbm [shape: bf16[32,32], index: 1, kind: input, shape index: {}]   ;;  %s373_s2 = inlined_call_operand.hbm [shape: f32[1,32], index: 2, kind: input, shape index: {}]   ;;  %s374_s3 = inlined_call_operand.hbm [shape: f32[32,32], index: 3, kind: output, shape index: {}]  }
   0x1   :  { %9 = vsyncpa [#allocation6], 0 }
   0x2   :  { %10 = vsyncpa [#allocation4], 0  ;;  %s283_s12 = smov [#allocation5]   ;;  %s189_s16 = scalar_lea.hbm %s372_s1, 256 }
   0x3   :  { %s28_s13 = sshll.u32 %s283_s12, 4  ;;  %p190_p0 = scmp.ne.s32.totalorder %s372_s1, %s189_s16  ;;  %s29_s13 = int_to_ptr.vmem [resolvable:$true] %s28_s13 }
   0x4   :  { %p193_p1 = scmp.lt.u32.totalorder %s189_s16, %s372_s1 }
   0x6   :  { %p195_p2 = pnand %p193_p1, %p190_p0 }
   0x8   :  { %198 = shalt.err (!%p195_p2)
}
   0x9   :  { %s199_s21 = scalar_lea.vmem %s29_s13, 256  ;;  %p204_p4 = scmp.lt.s32.totalorder %s29_s13, %s29_s13 }
   0xa   :  { %p200_p3 = scmp.ne.s32.totalorder %s29_s13, %s199_s21  ;;  %p205_p5 = scmp.lt.s32.totalorder %s199_s21, %s199_s21 }
   0xc   :  { %p206_p6 = por %p205_p5, %p204_p4 }
   0xe   :  { %p207_p7 = pnand %p206_p6, %p200_p3 }
  0x10   :  { %210 = shalt.err (!%p207_p7)
}
  0x11   :  { %s284_s22 = smov 64   ;;  %s285_s23 = smov 4  }
  0x12   :  { %34 = dma.hbm_to_vmem [thread:$0]  %s372_s1, 256, %s29_s13, [#allocation6], %s284_s22, %s284_s22, %s285_s23  }
  0x13   :  { %s286_s26 = smov [#allocation2]   ;;  %s211_s30 = scalar_lea.hbm %s371_s0, 512 }
  0x14   :  { %s16_s27 = sshll.u32 %s286_s26, 4  ;;  %p212_p8 = scmp.ne.s32.totalorder %s371_s0, %s211_s30  ;;  %s17_s27 = int_to_ptr.vmem [resolvable:$true] %s16_s27 }
  0x15   :  { %p215_p9 = scmp.lt.u32.totalorder %s211_s30, %s371_s0 }
  0x17   :  { %p217_p10 = pnand %p215_p9, %p212_p8 }
  0x19   :  { %220 = shalt.err (!%p217_p10)
}
  0x1a   :  { %s221_s8 = scalar_lea.vmem %s17_s27, 512  ;;  %p226_p12 = scmp.lt.s32.totalorder %s17_s27, %s17_s27 }
  0x1b   :  { %p222_p11 = scmp.ne.s32.totalorder %s17_s27, %s221_s8  ;;  %p227_p13 = scmp.lt.s32.totalorder %s221_s8, %s221_s8 }
  0x1d   :  { %p228_p0 = por %p227_p13, %p226_p12 }
  0x1f   :  { %p229_p1 = pnand %p228_p0, %p222_p11 }
  0x21   :  { %232 = shalt.err (!%p229_p1)
}
  0x22   :  { %s287_s1 = smov 128   ;;  %s288_s9 = smov 8  }
  0x23   :  { %22 = dma.hbm_to_vmem [thread:$0]  %s371_s0, 512, %s17_s27, [#allocation3], %s287_s1, %s287_s1, %s288_s9  }
  0x24   :  { %s289_s12 = smov [#allocation7]   ;;  %s233_s16 = scalar_lea.hbm %s373_s2, 16 }
  0x25   :  { %s41_s13 = sshll.u32 %s289_s12, 4  ;;  %p234_p2 = scmp.ne.s32.totalorder %s373_s2, %s233_s16  ;;  %s42_s13 = int_to_ptr.vmem [resolvable:$true] %s41_s13 }
  0x26   :  { %p237_p3 = scmp.lt.u32.totalorder %s233_s16, %s373_s2 }
  0x28   :  { %p239_p4 = pnand %p237_p3, %p234_p2 }
  0x2a   :  { %242 = shalt.err (!%p239_p4)
}
  0x2b   :  { %s243_s21 = scalar_lea.vmem %s42_s13, 16  ;;  %s247_s0 = scalar_lea.vmem %s42_s13, 32 }
  0x2c   :  { %p244_p5 = scmp.ne.s32.totalorder %s42_s13, %s243_s21  ;;  %p248_p6 = scmp.lt.s32.totalorder %s42_s13, %s42_s13 }
  0x2d   :  { %p249_p7 = scmp.lt.s32.totalorder %s247_s0, %s243_s21 }
  0x2f   :  { %p250_p8 = por %p249_p7, %p248_p6 }
  0x31   :  { %p251_p9 = pnand %p250_p8, %p244_p5 }
  0x33   :  { %254 = shalt.err (!%p251_p9)
}
  0x34   :  { %44 = dma.hbm_to_vmem [thread:$0]  %s373_s2, 16, %s42_s13, [#allocation6]  }
  0x35   :  { %277 = dma.done.wait [#allocation3], 512  }
  0x36   :  { %278 = vsyncadd [#allocation3], 4294966784 }
  0x37   :  { %279 = dma.done.wait [#allocation6], 272  }
  0x38   :  { %280 = vsyncadd [#allocation6], 4294967024  ;;  %v187_v0 = vld [vmem:[#allocation5] sm:$0xff]   ;;  %v188_v1 = vld [vmem:[#allocation5 + $0x8] sm:$0xff]   ;;  %vm84_vm0 = vcmask 261120   ;;  %s290_s2 = smov [#allocation8]  }
  0x39   :  { %171 = vmatprep.subr.bf16.mxu0 %v187_v0  ;;  %v55_v2 = vld [vmem:[#allocation2] sm:$0xff]  ;;  %v56_v3 = vld [vmem:[#allocation2 + $0x8] sm:$0xff]  ;;  %v57_v5 = vld [vmem:[#allocation2 + $0x10] sm:$0xff]  ;;  %s149_s24 = sshll.u32 %s290_s2, 4  ;;  %s150_s24 = int_to_ptr.vmem [resolvable:$true] %s149_s24 }
  0x3a   :  { %172 = vmatpush3.bf16.msra.mxu0 %v187_v0  ;;  %v59_v4 = vpack.c.bf16 %v56_v3, %v55_v2  ;;  %v58_v6 = vld [vmem:[#allocation2 + $0x18] sm:$0xff]  ;;  %v162_v8 = vld [vmem:[#allocation7] ss:$0 sm:$0xff]  ;;  %s255_s25 = scalar_lea.vmem %s150_s24, 512  ;;  %p260_p11 = scmp.lt.s32.totalorder %s150_s24, %s150_s24 }
  0x3b   :  { %173 = vmatprep.subr.bf16.mxu0 %v188_v1  ;;  %v60_v7 = vpack.c.bf16 %v58_v6, %v57_v5  ;;  %p256_p10 = scmp.ne.s32.totalorder %s150_s24, %s255_s25  ;;  %p261_p12 = scmp.lt.s32.totalorder %s255_s25, %s255_s25 }
  0x3c   :  { %175 = vmatprep.mubr.msk.bf16.mxu0 %vm84_vm0, %v59_v4 }
  0x3d   :  { %p262_p13 = por %p261_p12, %p260_p11 }
  0x3e   :  { %174 = vmatpush3.bf16.msra.mxu0 %v188_v1 }
  0x3f   :  { %p263_p0 = pnand %p262_p13, %p256_p10 }
  0x41   :  { %176 = vmatmul.mubr.msk.bf16.vlgmr.msra.gmra.mrb[0].mxu0 %vm84_vm0, %v60_v7 }
 0x114   :  { %v177_v9 = vpop.f32.mrb[0].mxu0 }
 0x115   :  { %v134_v10 = vadd.f32 %v177_v9, %v162_v8  ;;  %v125_v11 = vpop.f32.mrb[1].mxu0 }
 0x116   :  { %v126_v12 = vadd.f32 %v162_v8, %v125_v11  ;;  %v178_v13 = vpop.f32.mrb[2].mxu0 }
 0x117   :  { %142 = vst.msk [vmem:[#allocation8 + $0x10] sm:$0xff] %vm84_vm0, %v134_v10  ;;  %v137_v14 = vadd.f32 %v178_v13, %v162_v8  ;;  %v128_v15 = vpop.f32.mrb[3].mxu0 }
 0x118   :  { %140 = vst.msk [vmem:[#allocation8] sm:$0xff] %vm84_vm0, %v126_v12  ;;  %v129_v16 = vadd.f32 %v162_v8, %v128_v15 }
 0x119   :  { %143 = vst.msk [vmem:[#allocation8 + $0x18] sm:$0xff] %vm84_vm0, %v137_v14 }
 0x11a   :  { %141 = vst.msk [vmem:[#allocation8 + $0x8] sm:$0xff] %vm84_vm0, %v129_v16 }
 0x11b   :  { %266 = shalt.err (!%p263_p0)
}
 0x11c   :  { %s267_s28 = scalar_lea.hbm %s374_s3, 512 }
 0x11d   :  { %p268_p1 = scmp.ne.s32.totalorder %s374_s3, %s267_s28  ;;  %p271_p2 = scmp.lt.u32.totalorder %s267_s28, %s374_s3 }
 0x11f   :  { %p273_p3 = pnand %p271_p2, %p268_p1 }
 0x121   :  { %276 = shalt.err (!%p273_p3)
}
 0x122   :  { %155 = dma.vmem_to_hbm [thread:$0]  %s150_s24, 512, %s374_s3, [#allocation4], %s287_s1, %s287_s1, %s288_s9  }
 0x123   :  { %281 = dma.done.wait [#allocation4], 512  }
 0x124   :  { %282 = vsyncadd [#allocation4], 4294966784 }
 0x125   :  { %159 = vsyncpa [#allocation3], 1 }
 0x126   :  { %160 = vsyncpa [#allocation6], 1 }
 0x127   :  { %161 = vsyncpa [#allocation4], 1 }

</bundles_post_ra>
